<compile_context>
chip_gen: v6e
topology: v6e:2x2x1
jax: 0.10.0
libtpu: 0.0.40
codegen_flags: <defaults>
</compile_context>

<pallas_src>
import math

import jax
import jax.numpy as jnp
from jax.experimental import pallas as pl
from jax.experimental.pallas import tpu as pltpu

_MIB = 1 << 20
_DEFAULT_BUDGET = 12 * _MIB            # target per-step working set for tiling


def _vmem_limit(est_bytes):
    return int(max(32 * _MIB, min(int(est_bytes * 1.3), 96 * _MIB)))


# ---------------------------------------------------------------------------
# 1x1 conv (pointwise): channel-first matmul, lane axis = spatial tile.
# Optionally fuses the "+ top_down" of the FPN merge into the same kernel.
# ---------------------------------------------------------------------------
def _make_conv1x1_kernel(compute_dtype, fused):
    def body(x_ref, w_ref, b_ref, o_ref, td_ref=None):
        # x_ref: (1, Cin, t)  w_ref: (Cout, Cin)  b_ref: (Cout, 1)
        acc = jax.lax.dot_general(
            w_ref[...], x_ref[0].astype(compute_dtype),
            dimension_numbers=(((1,), (0,)), ((), ())),
            preferred_element_type=jnp.float32)               # (Cout, t) f32
        if td_ref is not None:
            acc = acc + td_ref[0].astype(jnp.float32)
        o_ref[0] = (acc + b_ref[...]).astype(o_ref.dtype)

    if fused:
        def kernel(x_ref, td_ref, w_ref, b_ref, o_ref):
            body(x_ref, w_ref, b_ref, o_ref, td_ref)
    else:
        def kernel(x_ref, w_ref, b_ref, o_ref):
            body(x_ref, w_ref, b_ref, o_ref)
    return kernel


def _pick_spatial_tile(HW, bytes_per_col, budget):
    """Lane-dense spatial tile that divides HW (avoids wrapper pad/slice)."""
    t_max = max(128, (budget // max(bytes_per_col, 1)) // 128 * 128)
    if HW <= t_max:
        return HW, HW                       # one full-extent block, no padding
    t = t_max
    while t >= 128:
        if HW % t == 0:
            return t, HW                    # 128-aligned divisor, no padding
        t -= 128
    # TODO(synk): handle the ragged last tile with a masked store instead of a
    #             pad/slice pass; only reached when HW has no aligned divisor.
    t = t_max
    return t, pl.cdiv(HW, t) * t


def conv1x1(x_nchw, w_io, b, top_down=None, *, compute_dtype=jnp.bfloat16,
            out_dtype=None, vmem_budget=_DEFAULT_BUDGET):
    """Pointwise conv in NCHW.  w_io: (Cin, Cout).  Optionally fuses + top_down."""
    N, Cin, H, W = x_nchw.shape
    Cout = w_io.shape[1]
    HW = H * W
    out_dtype = jnp.dtype(out_dtype if out_dtype is not None else x_nchw.dtype)
    fused = top_down is not None

    xb_ = jnp.dtype(x_nchw.dtype).itemsize
    cb_ = jnp.dtype(compute_dtype).itemsize
    ob_ = out_dtype.itemsize
    tdb_ = jnp.dtype(top_down.dtype).itemsize if fused else 0
    # Per-lane-column working set: double-buffered x/out (+ td), cast copy, acc.
    bytes_per_col = (2 * Cin * xb_ + Cin * cb_ + 2 * Cout * ob_ + Cout * 4
                     + (2 * Cout * tdb_ if fused else 0))
    t, HWp = _pick_spatial_tile(HW, bytes_per_col, vmem_budget)

    x2 = x_nchw.reshape(N, Cin, HW)                     # contiguous reshape
    td2 = None if not fused else top_down.reshape(N, Cout, HW)
    if HWp != HW:                                       # rare fallback
        x2 = jnp.pad(x2, ((0, 0), (0, 0), (0, HWp - HW)))
        if fused:
            td2 = jnp.pad(td2, ((0, 0), (0, 0), (0, HWp - HW)))

    w_oi = jnp.transpose(w_io).astype(compute_dtype)    # (Cout, Cin), tiny
    b2 = b.reshape(Cout, 1).astype(jnp.float32)

    grid = (N, HWp // t)
    x_spec = pl.BlockSpec((1, Cin, t), lambda n, i: (n, 0, i))
    td_spec = pl.BlockSpec((1, Cout, t), lambda n, i: (n, 0, i))
    w_spec = pl.BlockSpec((Cout, Cin), lambda n, i: (0, 0))
    b_spec = pl.BlockSpec((Cout, 1), lambda n, i: (0, 0))
    o_spec = pl.BlockSpec((1, Cout, t), lambda n, i: (n, 0, i))

    flops = 2 * N * HWp * Cin * Cout + (N * HWp * Cout if fused else 0)
    bytes_accessed = (N * Cin * HWp * xb_ + Cin * Cout * cb_ + Cout * 4
                      + N * Cout * HWp * ob_
                      + (N * Cout * HWp * tdb_ if fused else 0))
    cost = pl.CostEstimate(flops=flops, transcendentals=0,
                           bytes_accessed=bytes_accessed)
    cparams = pltpu.CompilerParams(
        dimension_semantics=("parallel", "parallel"),
        vmem_limit_bytes=_vmem_limit(bytes_per_col * t))

    kernel = _make_conv1x1_kernel(compute_dtype, fused)
    in_specs = ([x_spec, td_spec, w_spec, b_spec] if fused
                else [x_spec, w_spec, b_spec])
    args = (x2, td2, w_oi, b2) if fused else (x2, w_oi, b2)

    out = pl.pallas_call(
        kernel,
        out_shape=jax.ShapeDtypeStruct((N, Cout, HWp), out_dtype),
        grid=grid, in_specs=in_specs, out_specs=o_spec,
        compiler_params=cparams, cost_estimate=cost,
    )(*args)

    if HWp != HW:
        out = out[:, :, :HW]
    return out.reshape(N, Cout, H, W)


# ---------------------------------------------------------------------------
# 3x3 conv (padding=1, stride=1): row-band tiled, per-dy MXU accumulation over
# a row-major flat band with halo rows.  Column wrap of the flat-shift trick is
# fixed with two pre-masked copies (masks built in-kernel from iota).
# ---------------------------------------------------------------------------
def _conv3x3_accumulate(xb, topv, botv, w_ref, b_ref, o_ref, *, W, Cin, Cout,
                        compute_dtype):
    # xb: (Cin, T) flat band; topv/botv: (Cin, W) row above/below (zeros at edges)
    T = xb.shape[-1]
    zcol = jnp.zeros((Cin, 1), xb.dtype)
    # Extended flat band: [0, row-above, band, row-below, 0]; tap (dy, dx) is a
    # pure lane shift of dy*W + dx into this buffer.
    xext = jnp.concatenate([zcol, topv, xb, botv, zcol], axis=1)
    xext = xext.astype(compute_dtype)                    # (Cin, T + 2W + 2)
    text = T + 2 * W + 2

    # Source column of extended position q is (q - 1) mod W.  Pre-zero the two
    # source columns that would wrap (dx==0 reads col W-1, dx==2 reads col 0).
    q = jax.lax.broadcasted_iota(jnp.int32, (1, text), 1)
    qm = q % W
    zero = jnp.zeros_like(xext)
    x_dx0 = jnp.where(qm == 0, zero, xext)               # source col W-1 zeroed
    x_dx2 = jnp.where(qm == 1, zero, xext)               # source col 0 zeroed

    acc = jnp.zeros((Cout, T), jnp.float32)
    for dy in range(3):                                  # per-dy: K = 3*Cin dot
        base = dy * W
        taps = jnp.concatenate(
            [x_dx0[:, base + 0:base + 0 + T],
             xext[:, base + 1:base + 1 + T],
             x_dx2[:, base + 2:base + 2 + T]], axis=0)   # (3*Cin, T)
        wk = w_ref[:, dy * 3 * Cin:(dy + 1) * 3 * Cin]   # (Cout, 3*Cin)
        acc = acc + jax.lax.dot_general(
            wk, taps, dimension_numbers=(((1,), (0,)), ((), ())),
            preferred_element_type=jnp.float32)
    o_ref[0] = (acc + b_ref[...]).astype(o_ref.dtype)


def _make_conv3x3_single_kernel(W, Cin, Cout, compute_dtype):
    def kernel(x_ref, w_ref, b_ref, o_ref):
        xb = x_ref[0]                                    # (Cin, H*W)
        zrow = jnp.zeros((Cin, W), xb.dtype)
        _conv3x3_accumulate(xb, zrow, zrow, w_ref, b_ref, o_ref, W=W, Cin=Cin,
                            Cout=Cout, compute_dtype=compute_dtype)
    return kernel


def _make_conv3x3_band_kernel(W, Cin, Cout, compute_dtype, halo_w):
    def kernel(x_ref, top_ref, bot_ref, w_ref, b_ref, o_ref):
        i = pl.program_id(1)
        nb = pl.num_programs(1)
        xb = x_ref[0]                                    # (Cin, band_rows*W)
        topv = top_ref[0, :, halo_w - W:]                # last row of chunk above
        botv = bot_ref[0, :, :W]                         # first row of chunk below
        topv = jnp.where(i == 0, jnp.zeros_like(topv), topv)
        botv = jnp.where(i == nb - 1, jnp.zeros_like(botv), botv)
        _conv3x3_accumulate(xb, topv, botv, w_ref, b_ref, o_ref, W=W, Cin=Cin,
                            Cout=Cout, compute_dtype=compute_dtype)
    return kernel


def conv3x3(x_nchw, w_hwio, b, *, compute_dtype=jnp.bfloat16, out_dtype=None,
            band_rows=None, vmem_budget=_DEFAULT_BUDGET):
    """3x3 conv, padding=1, stride=1, NCHW.  w_hwio: (3, 3, Cin, Cout)."""
    N, Cin, H, W = x_nchw.shape
    Cout = w_hwio.shape[-1]
    out_dtype = jnp.dtype(out_dtype if out_dtype is not None else x_nchw.dtype)

    xb_ = jnp.dtype(x_nchw.dtype).itemsize
    cb_ = jnp.dtype(compute_dtype).itemsize
    ob_ = out_dtype.itemsize
    # Halo chunk = smallest whole-row block whose flat width is lane-aligned.
    hrows = 128 // math.gcd(W, 128)
    halo_w = hrows * W

    def vmem_est(rows):
        T = rows * W
        text = T + 2 * W + 2
        return (2 * Cin * T * xb_ + 4 * Cin * halo_w * xb_    # band + halos (dbl)
                + 3 * Cin * text * cb_                        # xext + 2 masked
                + 3 * Cin * T * cb_                           # per-dy taps
                + Cout * T * 4 + 2 * Cout * T * ob_           # acc + out (dbl)
                + 9 * Cin * Cout * cb_ + Cout * 4)

    if band_rows is not None:
        bh = band_rows
    elif vmem_est(H) <= vmem_budget or H <= hrows:
        bh = H
    else:
        bh = hrows
        while bh + hrows < H and vmem_est(bh + hrows) <= vmem_budget:
            bh += hrows

    w_k = jnp.transpose(w_hwio.reshape(9 * Cin, Cout)).astype(compute_dtype)
    b2 = b.reshape(Cout, 1).astype(jnp.float32)

    if bh >= H:
        # Small map: single band per image (no halo streams).
        HW = H * W
        x2 = x_nchw.reshape(N, Cin, HW)
        flops = 2 * N * HW * 9 * Cin * Cout
        bytes_accessed = (N * Cin * HW * xb_ + 9 * Cin * Cout * cb_ + Cout * 4
                          + N * Cout * HW * ob_)
        out = pl.pallas_call(
            _make_conv3x3_single_kernel(W, Cin, Cout, compute_dtype),
            out_shape=jax.ShapeDtypeStruct((N, Cout, HW), out_dtype),
            grid=(N,),
            in_specs=[pl.BlockSpec((1, Cin, HW), lambda n: (n, 0, 0)),
                      pl.BlockSpec((Cout, 9 * Cin), lambda n: (0, 0)),
                      pl.BlockSpec((Cout, 1), lambda n: (0, 0))],
            out_specs=pl.BlockSpec((1, Cout, HW), lambda n: (n, 0, 0)),
            compiler_params=pltpu.CompilerParams(
                dimension_semantics=("parallel",),
                vmem_limit_bytes=_vmem_limit(vmem_est(H))),
            cost_estimate=pl.CostEstimate(flops=flops, transcendentals=0,
                                          bytes_accessed=bytes_accessed),
        )(x2, w_k, b2)
        return out.reshape(N, Cout, H, W)

    # Banded path: grid=(N, num_bands); the rows directly above/below the band
    # arrive via two lane-aligned halo-chunk streams (clamped index_maps, zeroed
    # in-kernel at the image edges).
    assert bh % hrows == 0, "band_rows must be a multiple of the halo chunk"
    Hp = pl.cdiv(H, bh) * bh
    if Hp != H:
        # Zero row padding keeps padding=1 semantics for rows < H; the extra
        # output rows are dropped below.
        x2 = jnp.pad(x_nchw, ((0, 0), (0, 0), (0, Hp - H), (0, 0)))
        x2 = x2.reshape(N, Cin, Hp * W)
    else:
        x2 = x_nchw.reshape(N, Cin, Hp * W)
    nb = Hp // bh
    T = bh * W
    rpb = bh // hrows                      # halo chunks per band
    nchunks = Hp // hrows

    x_spec = pl.BlockSpec((1, Cin, T), lambda n, i: (n, 0, i))
    top_spec = pl.BlockSpec(
        (1, Cin, halo_w), lambda n, i: (n, 0, jnp.maximum(i * rpb - 1, 0)))
    bot_spec = pl.BlockSpec(
        (1, Cin, halo_w),
        lambda n, i: (n, 0, jnp.minimum((i + 1) * rpb, nchunks - 1)))
    w_spec = pl.BlockSpec((Cout, 9 * Cin), lambda n, i: (0, 0))
    b_spec = pl.BlockSpec((Cout, 1), lambda n, i: (0, 0))
    o_spec = pl.BlockSpec((1, Cout, T), lambda n, i: (n, 0, i))

    flops = 2 * N * Hp * W * 9 * Cin * Cout
    bytes_accessed = (N * Cin * (Hp * W + 2 * nb * halo_w) * xb_
                      + 9 * Cin * Cout * cb_ + Cout * 4 + N * Cout * Hp * W * ob_)
    out = pl.pallas_call(
        _make_conv3x3_band_kernel(W, Cin, Cout, compute_dtype, halo_w),
        out_shape=jax.ShapeDtypeStruct((N, Cout, Hp * W), out_dtype),
        grid=(N, nb),
        in_specs=[x_spec, top_spec, bot_spec, w_spec, b_spec],
        out_specs=o_spec,
        compiler_params=pltpu.CompilerParams(
            dimension_semantics=("parallel", "parallel"),
            vmem_limit_bytes=_vmem_limit(vmem_est(bh))),
        cost_estimate=pl.CostEstimate(flops=flops, transcendentals=0,
                                      bytes_accessed=bytes_accessed),
    )(x2, x2, x2, w_k, b2)
    out = out.reshape(N, Cout, Hp, W)
    if Hp != H:
        out = out[:, :, :H, :]
    return out


# ---------------------------------------------------------------------------
# Glue: nearest-neighbour upsample (plain JAX, gather-free for integer ratios)
# ---------------------------------------------------------------------------
def nearest_upsample_nchw(x, Ht, Wt):
    N, C, Hs, Ws = x.shape
    if Ht % Hs == 0 and Wt % Ws == 0:
        rh, rw = Ht // Hs, Wt // Ws
        if rh == 1 and rw == 1:
            return x
        y = jnp.broadcast_to(x[:, :, :, None, :, None], (N, C, Hs, rh, Ws, rw))
        return y.reshape(N, C, Ht, Wt)
    # General case: PyTorch formula src = floor(dst * in / out), integer math.
    hi = (jnp.arange(Ht, dtype=jnp.int32) * Hs) // Ht
    wi = (jnp.arange(Wt, dtype=jnp.int32) * Ws) // Wt
    return x[:, :, hi][:, :, :, wi]


def papfn_forward(x_dict, params, *, compute_dtype=jnp.bfloat16):
    """Path-Aggregation FPN forward, NCHW in / NCHW out.

    Matmul operands use `compute_dtype` (f32 accumulation); intermediate
    `last_inner` activations are stored in `compute_dtype` to halve HBM traffic
    on the memory-bound 1x1 path.  Outputs keep the input dtype.
    """
    # TODO(synk): fuse the 2x nearest upsample into the conv1x1(+add) kernel
    #             (row-band grid + in-kernel repeat) so top_down never hits HBM.
    # TODO(synk): merge the smallest pyramid levels (HW < 128) into one call so
    #             the lane dimension stays >= 128 (avoids masked partial stores).
    L = len(params["inner_w"])
    feats = [x_dict[str(i)] for i in range(L)]
    out_dtype = feats[0].dtype
    inner_dtype = jnp.dtype(compute_dtype)

    last_inner = conv1x1(feats[L - 1], params["inner_w"][L - 1],
                         params["inner_b"][L - 1],
                         compute_dtype=compute_dtype, out_dtype=inner_dtype)
    results = [conv3x3(last_inner, params["layer_w"][L - 1],
                       params["layer_b"][L - 1],
                       compute_dtype=compute_dtype, out_dtype=out_dtype)]
    for idx in range(L - 2, -1, -1):
        Ht, Wt = feats[idx].shape[2], feats[idx].shape[3]
        top_down = nearest_upsample_nchw(last_inner, Ht, Wt)
        # Fused: last_inner = conv1x1(x) + top_down  (one kernel, one HBM pass)
        last_inner = conv1x1(feats[idx], params["inner_w"][idx],
                             params["inner_b"][idx], top_down=top_down,
                             compute_dtype=compute_dtype, out_dtype=inner_dtype)
        results.insert(0, conv3x3(last_inner, params["layer_w"][idx],
                                  params["layer_b"][idx],
                                  compute_dtype=compute_dtype,
                                  out_dtype=out_dtype))
    return {str(i): results[i] for i in range(len(results))}


# ---------------------------------------------------------------------------
# Pure-JAX reference (lax.conv) for correctness checking
# ---------------------------------------------------------------------------
def _ref_forward(x_dict, params):
    def c1(x, w, b):
        y = jax.lax.conv_general_dilated(
            x, w.reshape(1, 1, *w.shape), (1, 1), "VALID",
            dimension_numbers=("NCHW", "HWIO", "NCHW"))
        return y + b.reshape(1, -1, 1, 1)

    def c3(x, w, b):
        y = jax.lax.conv_general_dilated(
            x, w, (1, 1), ((1, 1), (1, 1)),
            dimension_numbers=("NCHW", "HWIO", "NCHW"))
        return y + b.reshape(1, -1, 1, 1)

    L = len(params["inner_w"])
    feats = {int(k): v for k, v in x_dict.items()}
    last_inner = c1(feats[L - 1], params["inner_w"][L - 1],
                    params["inner_b"][L - 1])
    results = [c3(last_inner, params["layer_w"][L - 1], params["layer_b"][L - 1])]
    for idx in range(L - 2, -1, -1):
        lateral = c1(feats[idx], params["inner_w"][idx], params["inner_b"][idx])
        td = nearest_upsample_nchw(last_inner, lateral.shape[2], lateral.shape[3])
        last_inner = lateral + td
        results.insert(0, c3(last_inner, params["layer_w"][idx],
                             params["layer_b"][idx]))
    return {str(i): results[i] for i in range(len(results))}


def init_params(key, in_channels_list, out_channels):
    params = {"inner_w": [], "inner_b": [], "layer_w": [], "layer_b": []}
    for cin in in_channels_list:
        key, k1, k2, k3, k4 = jax.random.split(key, 5)
        params["inner_w"].append(
            0.1 * jax.random.normal(k1, (cin, out_channels), jnp.float32))
        params["inner_b"].append(
            0.1 * jax.random.normal(k2, (out_channels,), jnp.float32))
        params["layer_w"].append(
            0.1 * jax.random.normal(k3, (3, 3, out_channels, out_channels),
                                    jnp.float32))
        params["layer_b"].append(
            0.1 * jax.random.normal(k4, (out_channels,), jnp.float32))
    return params


if __name__ == "__main__":
    key = jax.random.PRNGKey(0)
    in_channels_list = [4, 8]
    out_channels = 8

    k0, k1, kp, kx = jax.random.split(key, 4)
    x = {
        "0": jax.random.normal(k0, (2, 4, 16, 16), jnp.float32),  # NCHW
        "1": jax.random.normal(k1, (2, 8, 8, 8), jnp.float32),    # NCHW
    }
    params = init_params(kp, in_channels_list, out_channels)
    ref = _ref_forward(x, params)

    # f32 compute path: matches the PyTorch/lax reference tightly.
    out32 = papfn_forward(x, params, compute_dtype=jnp.float32)
    out32 = {k: jax.block_until_ready(v) for k, v in out32.items()}
    for k in out32:
        assert out32[k].shape == (2, out_channels, *x[k].shape[2:]), out32[k].shape
        assert jnp.allclose(out32[k], ref[k], atol=1e-4, rtol=1e-4), k

    # Default bf16-operand path (f32 accumulation, bf16 intermediates).
    out16 = papfn_forward(x, params)
    out16 = {k: jax.block_until_ready(v) for k, v in out16.items()}
    for k in out16:
        assert out16[k].shape == (2, out_channels, *x[k].shape[2:]), out16[k].shape
        assert jnp.allclose(out16[k].astype(jnp.float32), ref[k],
                            atol=5e-2, rtol=5e-2), k

    # Exercise the band-tiled conv3x3 path (halo handling) at small shapes.
    xt = jax.random.normal(kx, (2, out_channels, 16, 16), jnp.float32)
    y_band = conv3x3(xt, params["layer_w"][0], params["layer_b"][0],
                     compute_dtype=jnp.float32, band_rows=8)
    y_band = jax.block_until_ready(y_band)
    y_ref = jax.lax.conv_general_dilated(
        xt, params["layer_w"][0], (1, 1), ((1, 1), (1, 1)),
        dimension_numbers=("NCHW", "HWIO", "NCHW"))
    y_ref = y_ref + params["layer_b"][0].reshape(1, -1, 1, 1)
    assert jnp.allclose(y_band, y_ref, atol=1e-4, rtol=1e-4)

    print("KERNEL_OK")
</pallas_src>

<mosaic_0001>
module attributes {stable_mosaic.version = 11 : i64} {
  func.func @kernel(%arg0: i32, %arg1: i32, %arg2: memref<1x8x64xf32, #tpu.memory_space<vmem>>, %arg3: memref<8x8xf32, #tpu.memory_space<vmem>>, %arg4: memref<8x1xf32, #tpu.memory_space<vmem>>, %arg5: memref<1x8x64xf32, #tpu.memory_space<vmem>>) attributes {dimension_semantics = [#tpu.dimension_semantics<parallel>, #tpu.dimension_semantics<parallel>], iteration_bounds = array<i64: 2, 1>, scalar_prefetch = 0 : i64, scratch_operands = 0 : i64, tpu.core_type = #tpu.core_type<tc>, window_params = [{transform_indices = @transform_0, window_bounds = array<i64: 1, 8, 64>}, {pipeline_mode = #tpu.pipeline_mode<synchronous>, transform_indices = @transform_1, window_bounds = array<i64: 8, 8>}, {pipeline_mode = #tpu.pipeline_mode<synchronous>, transform_indices = @transform_2, window_bounds = array<i64: 8, 1>}, {transform_indices = @transform_3, window_bounds = array<i64: 1, 8, 64>}]} {
    %c0 = arith.constant 0 : index
    %c0_0 = arith.constant 0 : index
    %0 = vector.load %arg3[%c0, %c0_0] : memref<8x8xf32, #tpu.memory_space<vmem>>, vector<8x8xf32>
    %c0_1 = arith.constant 0 : index
    %c0_2 = arith.constant 0 : index
    %c0_3 = arith.constant 0 : index
    %1 = vector.load %arg2[%c0_1, %c0_2, %c0_3] : memref<1x8x64xf32, #tpu.memory_space<vmem>>, vector<1x8x64xf32>
    %2 = vector.shape_cast %1 : vector<1x8x64xf32> to vector<8x64xf32>
    %cst = arith.constant dense<0.000000e+00> : vector<8x64xf32>
    %3 = tpu.matmul %0, %2, %cst {dimension_numbers = #tpu.dot_dimension_numbers<[1], [0], [0], [1], [0, 0, 1, 1], [], []>} : vector<8x8xf32>, vector<8x64xf32>, vector<8x64xf32> -> vector<8x64xf32>
    %c0_4 = arith.constant 0 : index
    %c0_5 = arith.constant 0 : index
    %4 = vector.load %arg4[%c0_4, %c0_5] : memref<8x1xf32, #tpu.memory_space<vmem>>, vector<8x1xf32>
    %5 = vector.broadcast %4 : vector<8x1xf32> to vector<8x64xf32>
    %6 = arith.addf %3, %5 : vector<8x64xf32>
    %c0_6 = arith.constant 0 : index
    %c0_7 = arith.constant 0 : index
    %c0_8 = arith.constant 0 : index
    %7 = vector.load %arg5[%c0_6, %c0_7, %c0_8] : memref<1x8x64xf32, #tpu.memory_space<vmem>>, vector<1x8x64xf32>
    %8 = vector.shape_cast %7 : vector<1x8x64xf32> to vector<8x64xf32>
    %9 = vector.shape_cast %6 : vector<8x64xf32> to vector<1x8x64xf32>
    tpu.vector_store %arg5[%c0_6, %c0_7, %c0_8], %9 {strides = array<i32>} : memref<1x8x64xf32, #tpu.memory_space<vmem>>, vector<1x8x64xf32>,
    return
  }
  func.func @transform_0(%arg0: i32, %arg1: i32) -> (i32, i32, i32) {
    %c0_i32 = arith.constant 0 : i32
    %c0_i32_0 = arith.constant 0 : i32
    return %arg0, %c0_i32, %arg1 : i32, i32, i32
  }
  func.func @transform_1(%arg0: i32, %arg1: i32) -> (i32, i32) {
    %c0_i32 = arith.constant 0 : i32
    %c0_i32_0 = arith.constant 0 : i32
    %c0_i32_1 = arith.constant 0 : i32
    return %c0_i32, %c0_i32_0 : i32, i32
  }
  func.func @transform_2(%arg0: i32, %arg1: i32) -> (i32, i32) {
    %c0_i32 = arith.constant 0 : i32
    %c0_i32_0 = arith.constant 0 : i32
    %c0_i32_1 = arith.constant 0 : i32
    return %c0_i32, %c0_i32_0 : i32, i32
  }
  func.func @transform_3(%arg0: i32, %arg1: i32) -> (i32, i32, i32) {
    %c0_i32 = arith.constant 0 : i32
    %c0_i32_0 = arith.constant 0 : i32
    return %arg0, %c0_i32, %arg1 : i32, i32, i32
  }
}

</mosaic_0001>

<bundles_post_ra>
// kernel: tpu_custom_call.1
= control target key start
LH: loop header
LB: loop body
LE: loop exit
PB: predicated region body
PF: predicated region fallthrough
CT: control target
= control target key end

     0   :  { %8 = vsyncpa [#allocation3], 0  ;;  %s750_s0 = inlined_call_operand.hbm [shape: f32[2,8,64], index: 0, kind: input, shape index: {}]   ;;  %s751_s1 = inlined_call_operand.vmem [shape: f32[8,8], index: 1, kind: input, shape index: {}]   ;;  %s752_s2 = inlined_call_operand.vmem [shape: f32[8,1], index: 2, kind: input, shape index: {}]   ;;  %s753_s3 = inlined_call_operand.hbm [shape: f32[2,8,64], index: 3, kind: output, shape index: {}]  }
   0x1   :  { %10 = vsyncpa [#allocation3 + $0x1], 0 }
   0x2   :  { %11 = vsyncpa [#allocation4], 0 }
   0x3   :  { %13 = vsyncpa [#allocation4 + $0x1], 0  ;;  %s604_s12 = smov 0   ;;  %s606_s13 = smov 0  }
   0x4   :  { %s608_s14 = smov 0   ;;  %s610_s15 = smov 0  }
   0x5   :  { %s612_s16 = smov 0   ;;  %s614_s17 = smov 0  }
   0x6 LB: > { %s382_s18 = sadd.s32 4294967295, %s577_s17   ;;  %s383_s19 = sadd.s32 4294967294, %s577_s17   ;;  %s577_s17 = sphi %s614_s17, %s19_s17   ;;  %s573_s16 = sphi %s612_s16, %s765_s16   ;;  %s569_s15 = sphi %s610_s15, %s764_s15   ;;  %s565_s14 = sphi %s608_s14, %s763_s14   ;;  %s561_s13 = sphi %s606_s13, %s762_s13   ;;  %s557_s12 = sphi %s604_s12, %s761_s12  }
   0x7   : > { %s31_s20 = sadd.s32 1, %s573_s16  ;;  %s40_s21 = sadd.s32 1, %s565_s14 }
   0x8   : > { %p33_p0 = scmp.ge.s32.totalorder %s31_s20, 2  ;;  %p47_p1 = scmp.ne.s32.totalorder %s565_s14, %s561_s13 }
   0x9   : > { %p48_p2 = scmp.eq.s32.totalorder %s577_s17, 0  ;;  %p53_p3 = scmp.ne.s32.totalorder %s561_s13, %s557_s12 }
   0xa   : > { %s767_s20 = smov (%p33_p0, %s31_s20), 0  ;;  %p54_p5 = scmp.eq.s32.totalorder %s382_s18, 0 }
   0xb   : > { %p645_p4 = por %p48_p2, %p47_p1  ;;  %s35_s23 = ssub.s32 %s573_s16, %s767_s20 }
   0xc   : > { %p121_p6 = scmp.eq.s32.totalorder %s382_s18, 1  ;;  %p38_p7 = scmp.eq.s32.totalorder %s35_s23, 0 }
   0xd   : > { %p651_p8 = por %p54_p5, %p53_p3  ;;  %p127_p10 = scmp.eq.s32.totalorder %s383_s19, 1 }
   0xe   : > { %p655_p9 = por %p121_p6, %p47_p1  ;;  %p415_p13 = scmp.lt.s32.totalorder %s577_s17, 2 }
   0xf   : > { %s660_s26 = scalar_select %p38_p7, %s565_s14, %s40_s21  }
  0x10   : > { %p662_p11 = por %p127_p10, %p53_p3  ;;  %s153_s28 = sand.u32 1, %s565_s14  }
  0x11   : > { %s386_s29 = sshll.u32 %s153_s28, 3  ;;  %s387_s30 = sshll.u32 %s573_s16, 7 }
  0x12   : > { %s757_s27 = scalar_select %p662_p11, 1, 0 }
  0x13   : > { %s163_s6 = scalar_lea.hbm %s750_s0, %s387_s30  ;;  %s157_s7 = scalar_lea.vmem [#allocation2], %s386_s29 }
  0x14   : > { %s165_s8 = sshll.u32 %s157_s7, 4  ;;  %p675_p0 = pnand %p415_p13, %p645_p4  ;;  %s166_s8 = int_to_ptr.vmem [resolvable:$true] %s165_s8 }
  0x15   : > { %p388_p1 = scmp.ge.s32.totalorder %s577_s17, 1  ;;  %p170_p2 = scmp.lt.s32.totalorder %s577_s17, 3 }
  0x16   : > { %s154_s10 = scalar_lea.sflag [#allocation3], %s153_s28  ;;  %p471_p3 = pneg %p675_p0 }
  0x17   : > { %s482_s11 = scalar_lea.vmem %s166_s8, 128  ;;  %s579_s18 = smov [#allocation2]  }
  0x18   : > { %p483_p5 = scmp.ne.s32.totalorder %s166_s8, %s482_s11  ;;  %s487_s19 = sshll.u32 %s579_s18, 4  ;;  %s488_s19 = int_to_ptr.vmem [resolvable:$false] %s487_s19 }
  0x19   : > { %s489_s21 = scalar_lea.vmem %s488_s19, 256  ;;  %p490_p10 = scmp.lt.s32.totalorder %s166_s8, %s488_s19 }
  0x1a   : > { %p485_p6 = pnand %p483_p5, %p471_p3  ;;  %p491_p12 = scmp.lt.s32.totalorder %s489_s21, %s482_s11 }
  0x1c   : > { %p486_p7 = pneg %p485_p6  ;;  %p492_p4 = por %p491_p12, %p490_p10 }
  0x1e   : > { %p493_p13 = pnand %p492_p4, %p486_p7 }
  0x20   : > { %496 = shalt.err (!%p493_p13)
}
  0x21   : > { %410 = dma.hbm_to_vmem [thread:$0]  (!%p675_p0), %s163_s6, 128, %s166_s8, %s154_s10  }
  0x22   : > { %p171_p11 = pnand %p388_p1, %p170_p2 }
  0x23   : > { %s690_s22 = sand.u32 (!%p171_p11), 1, %s561_s13  }
  0x24   : > { %174 = sbr.rel (%p171_p11) target bundleno = 253 (0xfd), region = 32  ;;  %s389_s23 = sshll.u32 (!%p171_p11), %s690_s22, 3 }
  0x25   : > { %s177_s28 = scalar_lea.sflag (!%p171_p11), [#allocation3], %s690_s22  ;;  %s180_s29 = scalar_lea.vmem (!%p171_p11), [#allocation2], %s389_s23 }
  0x29   : > { %548 = dma.done.wait (%p651_p8), %s177_s28, 128  }
  0x2a   : > { %550 = vsyncadd (%p651_p8), %s177_s28, 4294967168  ;;  %v580_v0 = vmov 0.0   ;;  %vm581_vm0 = vmmov 0   ;;  %v582_v1 = vmov 0   ;;  %vm211_vm1 = vcmask 64512   ;;  %v204_v2 = vld [vmem:[%s180_s29] sm:$0xff] }
  0x2b   : > { %398 = vmatprep.subr.mxu0 %v580_v0  ;;  %400 = vmatprep.mubr.msk.f32.mxu0 %vm581_vm0, %v580_v0  ;;  %v203_v3 = vld [vmem:[%s751_s1] sm:$0xff]  ;;  %s393_s24 = sshll.u32 %s569_s15, 7  ;;  %s202_s7 = scalar_lea.vmem [#allocation5], %s389_s23  ;;  %vm285_vm2 = vcmask 523264  }
  0x2c   : > { %468 = vset.pattern.permute.xlu0 %v582_v1  ;;  %v205_v4 = vld [vmem:[%s752_s2] sm:$0xff]  ;;  %399 = vmatpush3.msra.mxu0 %v204_v2  ;;  %s302_s8 = sshll.u32 %s202_s7, 4  ;;  %s708_s11 = scalar_lea.hbm %s753_s3, %s393_s24  ;;  %s303_s8 = int_to_ptr.vmem [resolvable:$true] %s302_s8 }
  0x2d   : > { %208 = vperm.xlu0 %468, %v205_v4   ;;  %401 = vmatmul.mubr.msk.f32.vlgmr.msra.gmra.mxu0 %vm211_vm1, %v203_v3  ;;  %s288_s18 = scalar_lea.sflag [#allocation4], %s690_s22  ;;  %s497_s19 = scalar_lea.vmem %s303_s8, 128 }
  0x2e   : > { %p498_p8 = scmp.ne.s32.totalorder %s303_s8, %s497_s19  ;;  %s583_s15 = smov [#allocation5]  }
  0x2f   : > { %s501_s21 = sshll.u32 %s583_s15, 4  ;;  %s502_s21 = int_to_ptr.vmem [resolvable:$false] %s501_s21 }
  0x30   : > { %p499_p11 = pnand %p498_p8, %p655_p9  ;;  %s503_s23 = scalar_lea.vmem %s502_s21, 256 }
  0x31   : > { %p504_p0 = scmp.lt.s32.totalorder %s303_s8, %s502_s21  ;;  %p505_p1 = scmp.lt.s32.totalorder %s503_s23, %s497_s19 }
  0x32   : > { %p500_p12 = pneg %p499_p11 }
  0x33   : > { %p506_p2 = por %p505_p1, %p504_p0 }
  0x35   : > { %p507_p3 = pnand %p506_p2, %p500_p12 }
  0xa8   : > { %v209_v5 = vpop.permute.xlu0 %208 }
  0xed   : > { %v281_v6 = vpop.f32.mrf.mxu0 }
  0xee   : > { %v282_v7 = vadd.f32 %v281_v6, %v209_v5 }
  0xef   : > { %v402_v8 = vpop.f32.mrf.mxu0 }
  0xf0   : > { %286 = vst.msk [vmem:[%s202_s7] sm:$0xff] %vm285_vm2, %v282_v7 }
  0xf1   : > { %510 = shalt.err (!%p507_p3)
}
  0xf2   : > { %s511_s28 = scalar_lea.hbm %s708_s11, 128  ;;  %s515_s30 = scalar_lea.hbm %s753_s3, 256 }
  0xf3   : > { %p512_p5 = scmp.ne.s32.totalorder %s708_s11, %s511_s28  ;;  %p516_p10 = scmp.lt.s32.totalorder %s708_s11, %s753_s3 }
  0xf4   : > { %p517_p4 = scmp.lt.s32.totalorder %s515_s30, %s511_s28 }
  0xf5   : > { %p513_p6 = pnand %p512_p5, %p655_p9 }
  0xf6   : > { %p518_p13 = por %p517_p4, %p516_p10 }
  0xf7   : > { %p514_p7 = pneg %p513_p6 }
  0xf9   : > { %p519_p8 = pnand %p518_p13, %p514_p7 }
  0xfb   : > { %522 = shalt.err (!%p519_p8)
}
  0xfc   : > { %405 = dma.vmem_to_hbm [thread:$0]  (%p655_p9), %s303_s8, 128, %s708_s11, %s288_s18  }
  0xfd PF: > { %s314_s6 = sand.u32 1, %s557_s12   ;;  %p759_p11 = scmp.ne.s32.totalorder %s757_s27, 0 }
  0xfe   : > { %p760_p12 = scmp.ge.s32.totalorder %s577_s17, 2  ;;  %s315_s24 = scalar_lea.sflag [#allocation4], %s314_s6 }
 0x100   : > { %p412_p0 = pnand %p760_p12, %p759_p11 }
 0x102   : > { %p413_p1 = pneg %p412_p0 }
 0x104   : > { %552 = dma.done.wait (%p413_p1), %s315_s24, 128  }
 0x105   : > { %554 = vsyncadd (%p413_p1), %s315_s24, 4294967168  ;;  %s19_s17 = sadd.s32 1, %s577_s17   ;;  %s761_s12 = smov %s561_s13 }
 0x106   : > { %p16_p2 = scmp.ge.s32.totalorder %s19_s17, 4   ;;  %s762_s13 = smov %s565_s14 }
 0x107   : > { %s763_s14 = smov %s660_s26  ;;  %s764_s15 = smov %s573_s16 }
 0x108   : > { %s765_s16 = smov %s767_s20  ;;  %18 = sbr.rel (!%p16_p2) target bundleno = 6 (0x6), region = 77 }
 0x10d   :  { %320 = vsyncpa [#allocation3], 1 }
 0x10e   :  { %322 = vsyncpa [#allocation3 + $0x1], 1 }
 0x10f   :  { %323 = vsyncpa [#allocation4], 1 }
 0x110   :  { %325 = vsyncpa [#allocation4 + $0x1], 1 }

</bundles_post_ra>
